<compile_context>
chip_gen: v6e
topology: v6e:2x2x1
jax: 0.10.0
libtpu: 0.0.40
codegen_flags: <defaults>
</compile_context>

<pallas_src>
import functools

import jax
import jax.numpy as jnp
import numpy as np
from jax.experimental import pallas as pl
from jax.experimental.pallas import tpu as pltpu


def _grad_kernel(x_ref, mx_ref, my_ref, gx_ref, gy_ref, *, shift_x, shift_y):
    """One (tile_rows, L) tile; each row is one flattened (b, c) image."""
    x = x_ref[...]
    # Circular lane rotations (XLU slot, non-negative shifts):
    #   shift_x = L - 1  ->  x_w[flat] = x[(flat + 1) % L]  (== x[h, w+1])
    #   shift_y = L - W  ->  x_h[flat] = x[(flat + W) % L]  (== x[h+1, w])
    x_w = pltpu.roll(x, shift_x, axis=1)
    x_h = pltpu.roll(x, shift_y, axis=1)
    # {0,1} masks (one VPU mul each) zero the last column / last row, which
    # also kills the circular wrap-around contributions.
    gx_ref[...] = (x_w - x) * mx_ref[...]
    gy_ref[...] = (x_h - x) * my_ref[...]


def _choose_row_tile(n_rows, row_bytes, target_bytes=2 * 1024 * 1024):
    """Pick the sublane tile: whole problem if small, else a multiple of 8
    sized to ~target_bytes per (double-buffered) stream."""
    if n_rows * row_bytes <= target_bytes:
        return n_rows  # block dim == full dim: no (8,128) constraint.
    tile = max(8, (target_bytes // max(row_bytes, 1)) // 8 * 8)
    # TODO(synk): extremely large single images (8 rows exceeding the VMEM
    # budget) would additionally need a lane split with halo handling.
    return min(tile, n_rows)


def grad_forward(x: jax.Array) -> jax.Array:
    """Pallas implementation of Grad.forward: (B, C, H, W) -> (B, C, H, W, 2)."""
    B, C, H, W = x.shape
    N, L = B * C, H * W
    dtype = x.dtype
    itemsize = np.dtype(dtype).itemsize

    # Lane-dense flattened view: one (b, c) image per row.
    xf = x.reshape(N, L)

    # Precomputed {0,1} boundary masks (replace per-tile iota+cmp+select).
    idx = jnp.arange(L, dtype=jnp.int32)
    mask_x = ((idx % W) != (W - 1)).astype(dtype).reshape(1, L)   # w < W-1
    mask_y = (idx < (H - 1) * W).astype(dtype).reshape(1, L)      # h < H-1

    tile_rows = _choose_row_tile(N, L * itemsize)
    grid = (pl.cdiv(N, tile_rows),)

    shift_x = (L - 1) % L
    shift_y = (L - W) % L

    kernel = functools.partial(_grad_kernel, shift_x=shift_x, shift_y=shift_y)

    # Bandwidth-dominated: 1 read + 2 writes of the image, 2 subs + 2 muls/elem.
    cost = pl.CostEstimate(
        flops=4 * N * L,
        transcendentals=0,
        bytes_accessed=(3 * N * L + 2 * L) * itemsize,
    )

    gx, gy = pl.pallas_call(
        kernel,
        out_shape=(
            jax.ShapeDtypeStruct((N, L), dtype),
            jax.ShapeDtypeStruct((N, L), dtype),
        ),
        grid_spec=pltpu.PrefetchScalarGridSpec(
            num_scalar_prefetch=0,
            grid=grid,
            in_specs=[
                pl.BlockSpec((tile_rows, L), lambda i: (i, 0)),
                pl.BlockSpec((1, L), lambda i: (0, 0)),
                pl.BlockSpec((1, L), lambda i: (0, 0)),
            ],
            out_specs=[
                pl.BlockSpec((tile_rows, L), lambda i: (i, 0)),
                pl.BlockSpec((tile_rows, L), lambda i: (i, 0)),
            ],
        ),
        compiler_params=pltpu.CompilerParams(
            dimension_semantics=("parallel",),
            vmem_limit_bytes=32 * 1024 * 1024,
        ),
        cost_estimate=cost,
    )(xf, mask_x, mask_y)

    # Layout plumbing only: restore (B, C, H, W) and stack the two gradient
    # components along a trailing axis of size 2, matching the module output.
    return jnp.stack((gx.reshape(B, C, H, W), gy.reshape(B, C, H, W)), axis=-1)


def _grad_reference(x: jax.Array) -> jax.Array:
    """Pure-JAX mirror of the PyTorch Grad module."""
    gx = jnp.zeros_like(x).at[:, :, :, :-1].set(x[:, :, :, 1:] - x[:, :, :, :-1])
    gy = jnp.zeros_like(x).at[:, :, :-1, :].set(x[:, :, 1:, :] - x[:, :, :-1, :])
    return jnp.stack((gx, gy), axis=-1)


if __name__ == "__main__":
    key = jax.random.PRNGKey(0)
    B, C, H, W = 2, 4, 16, 16
    x = jax.random.normal(key, (B, C, H, W), dtype=jnp.float32)

    grad = grad_forward(x)
    grad = jax.block_until_ready(grad)

    grad_ref = _grad_reference(x)
    assert grad.shape == (B, C, H, W, 2)
    assert np.allclose(np.asarray(grad), np.asarray(grad_ref), rtol=1e-6, atol=1e-6)

    print("KERNEL_OK")
</pallas_src>

<mosaic_0001>
module attributes {stable_mosaic.version = 11 : i64} {
  func.func @_grad_kernel(%arg0: i32, %arg1: memref<8x256xf32, #tpu.memory_space<vmem>>, %arg2: memref<1x256xf32, #tpu.memory_space<vmem>>, %arg3: memref<1x256xf32, #tpu.memory_space<vmem>>, %arg4: memref<8x256xf32, #tpu.memory_space<vmem>>, %arg5: memref<8x256xf32, #tpu.memory_space<vmem>>) attributes {dimension_semantics = [#tpu.dimension_semantics<parallel>], iteration_bounds = array<i64: 1>, scalar_prefetch = 0 : i64, scratch_operands = 0 : i64, tpu.core_type = #tpu.core_type<tc>, window_params = [{transform_indices = @transform_0, window_bounds = array<i64: 8, 256>}, {pipeline_mode = #tpu.pipeline_mode<synchronous>, transform_indices = @transform_1, window_bounds = array<i64: 1, 256>}, {pipeline_mode = #tpu.pipeline_mode<synchronous>, transform_indices = @transform_2, window_bounds = array<i64: 1, 256>}, {transform_indices = @transform_3, window_bounds = array<i64: 8, 256>}, {transform_indices = @transform_4, window_bounds = array<i64: 8, 256>}]} {
    %c0 = arith.constant 0 : index
    %c0_0 = arith.constant 0 : index
    %0 = vector.load %arg1[%c0, %c0_0] : memref<8x256xf32, #tpu.memory_space<vmem>>, vector<8x256xf32>
    %c255_i32 = arith.constant 255 : i32
    %1 = tpu.dynamic_rotate %0 by %c255_i32 dim 1 : vector<8x256xf32>, i32 -> vector<8x256xf32>
    %c240_i32 = arith.constant 240 : i32
    %2 = tpu.dynamic_rotate %0 by %c240_i32 dim 1 : vector<8x256xf32>, i32 -> vector<8x256xf32>
    %3 = arith.subf %1, %0 : vector<8x256xf32>
    %c0_1 = arith.constant 0 : index
    %c0_2 = arith.constant 0 : index
    %4 = vector.load %arg2[%c0_1, %c0_2] : memref<1x256xf32, #tpu.memory_space<vmem>>, vector<1x256xf32>
    %5 = vector.broadcast %4 : vector<1x256xf32> to vector<8x256xf32>
    %6 = arith.mulf %3, %5 : vector<8x256xf32>
    %c0_3 = arith.constant 0 : index
    %c0_4 = arith.constant 0 : index
    %7 = vector.load %arg4[%c0_3, %c0_4] : memref<8x256xf32, #tpu.memory_space<vmem>>, vector<8x256xf32>
    tpu.vector_store %arg4[%c0_3, %c0_4], %6 {strides = array<i32>} : memref<8x256xf32, #tpu.memory_space<vmem>>, vector<8x256xf32>,
    %8 = arith.subf %2, %0 : vector<8x256xf32>
    %c0_5 = arith.constant 0 : index
    %c0_6 = arith.constant 0 : index
    %9 = vector.load %arg3[%c0_5, %c0_6] : memref<1x256xf32, #tpu.memory_space<vmem>>, vector<1x256xf32>
    %10 = vector.broadcast %9 : vector<1x256xf32> to vector<8x256xf32>
    %11 = arith.mulf %8, %10 : vector<8x256xf32>
    %c0_7 = arith.constant 0 : index
    %c0_8 = arith.constant 0 : index
    %12 = vector.load %arg5[%c0_7, %c0_8] : memref<8x256xf32, #tpu.memory_space<vmem>>, vector<8x256xf32>
    tpu.vector_store %arg5[%c0_7, %c0_8], %11 {strides = array<i32>} : memref<8x256xf32, #tpu.memory_space<vmem>>, vector<8x256xf32>,
    return
  }
  func.func @transform_0(%arg0: i32) -> (i32, i32) {
    %c0_i32 = arith.constant 0 : i32
    %c0_i32_0 = arith.constant 0 : i32
    return %arg0, %c0_i32 : i32, i32
  }
  func.func @transform_1(%arg0: i32) -> (i32, i32) {
    %c0_i32 = arith.constant 0 : i32
    %c0_i32_0 = arith.constant 0 : i32
    %c0_i32_1 = arith.constant 0 : i32
    return %c0_i32, %c0_i32_0 : i32, i32
  }
  func.func @transform_2(%arg0: i32) -> (i32, i32) {
    %c0_i32 = arith.constant 0 : i32
    %c0_i32_0 = arith.constant 0 : i32
    %c0_i32_1 = arith.constant 0 : i32
    return %c0_i32, %c0_i32_0 : i32, i32
  }
  func.func @transform_3(%arg0: i32) -> (i32, i32) {
    %c0_i32 = arith.constant 0 : i32
    %c0_i32_0 = arith.constant 0 : i32
    return %arg0, %c0_i32 : i32, i32
  }
  func.func @transform_4(%arg0: i32) -> (i32, i32) {
    %c0_i32 = arith.constant 0 : i32
    %c0_i32_0 = arith.constant 0 : i32
    return %arg0, %c0_i32 : i32, i32
  }
}

</mosaic_0001>

<bundles_post_ra>
// kernel: tpu_custom_call.1
= control target key start
LH: loop header
LB: loop body
LE: loop exit
PB: predicated region body
PF: predicated region fallthrough
CT: control target
= control target key end

     0   :  { %10 = vsyncpa [#allocation3], 0  ;;  %s266_s0 = inlined_call_operand.hbm [shape: f32[8,256], index: 0, kind: input, shape index: {}]   ;;  %s267_s1 = inlined_call_operand.hbm [shape: f32[1,256], index: 1, kind: input, shape index: {}]   ;;  %s268_s2 = inlined_call_operand.vmem [shape: f32[1,256], index: 2, kind: input, shape index: {}]   ;;  %s269_s3 = inlined_call_operand.hbm [shape: f32[8,256], index: 3, kind: output, shape index: {0}]   ;;  %s270_s4 = inlined_call_operand.hbm [shape: f32[8,256], index: 4, kind: output, shape index: {1}]  }
   0x1   :  { %11 = vsyncpa [#allocation6], 0 }
   0x2   :  { %12 = vsyncpa [#allocation4], 0 }
   0x3   :  { %13 = vsyncpa [#allocation9], 0  ;;  %s220_s15 = smov [#allocation2]   ;;  %s221_s17 = smov [#allocation5]  }
   0x4   :  { %s20_s16 = sshll.u32 %s220_s15, 4  ;;  %s30_s18 = sshll.u32 %s221_s17, 4  ;;  %s21_s16 = int_to_ptr.vmem [resolvable:$true] %s20_s16  ;;  %s31_s18 = int_to_ptr.vmem [resolvable:$true] %s30_s18 }
   0x5   :  { %s140_s19 = scalar_lea.vmem %s21_s16, 256  ;;  %p145_p1 = scmp.lt.s32.totalorder %s21_s16, %s21_s16 }
   0x6   :  { %p141_p0 = scmp.ne.s32.totalorder %s21_s16, %s140_s19  ;;  %p146_p2 = scmp.lt.s32.totalorder %s140_s19, %s140_s19 }
   0x8   :  { %p147_p3 = por %p146_p2, %p145_p1 }
   0xa   :  { %p148_p4 = pnand %p147_p3, %p141_p0 }
   0xc   :  { %151 = shalt.err (!%p148_p4)
}
   0xd   :  { %23 = dma.hbm_to_vmem [thread:$0]  %s266_s0, 256, %s21_s16, [#allocation3]  }
   0xe   :  { %s160_s22 = scalar_lea.vmem %s31_s18, 32  ;;  %p165_p6 = scmp.lt.s32.totalorder %s31_s18, %s31_s18 }
   0xf   :  { %p161_p5 = scmp.ne.s32.totalorder %s31_s18, %s160_s22  ;;  %p166_p7 = scmp.lt.s32.totalorder %s160_s22, %s160_s22 }
  0x11   :  { %p167_p8 = por %p166_p7, %p165_p6 }
  0x13   :  { %p168_p9 = pnand %p167_p8, %p161_p5 }
  0x15   :  { %171 = shalt.err (!%p168_p9)
}
  0x16   :  { %33 = dma.hbm_to_vmem [thread:$0]  %s267_s1, 32, %s31_s18, [#allocation6]  }
  0x17   :  { %212 = dma.done.wait [#allocation3], 256  }
  0x18   :  { %213 = vsyncadd [#allocation3], 4294967040 }
  0x19   :  { %214 = dma.done.wait [#allocation6], 32  }
  0x1a   :  { %215 = vsyncadd [#allocation6], 4294967264  ;;  %v42_v0 = vld [vmem:[#allocation2] sm:$0xff]  ;;  %s222_s25 = smov 112   ;;  %s223_s26 = smov 127   ;;  %v43_v1 = vld [vmem:[#allocation2 + $0x8] sm:$0xff]  ;;  %v48_v2 = vlaneseq }
  0x1b   :  { %53 = vrot.lane.b32.xlu1 %v42_v0, %s222_s25  ;;  %44 = vrot.lane.b32.xlu0 %v42_v0, %s223_s26  ;;  %v80_v9 = vld [vmem:[%s268_s2] sm:$0x3]  ;;  %v62_v10 = vld [vmem:[#allocation5] sm:$0x3]  ;;  %s224_s27 = smov [#allocation7]   ;;  %s225_s2 = smov [#allocation8]  }
  0x1c   :  { %v65_v3 = vshrl.u32 %v48_v2, 7  ;;  %v49_v4 = vand.u32 127, %v48_v2  ;;  %s102_s28 = sshll.u32 %s224_s27, 4  ;;  %s112_s29 = sshll.u32 %s225_s2, 4  ;;  %s103_s28 = int_to_ptr.vmem [resolvable:$true] %s102_s28  ;;  %s113_s29 = int_to_ptr.vmem [resolvable:$true] %s112_s29 }
  0x1d   :  { %s172_s30 = scalar_lea.vmem %s103_s28, 256  ;;  %p177_p11 = scmp.lt.s32.totalorder %s103_s28, %s103_s28 }
  0x1e   :  { %v66_v7 = vsub.s32 0, %v65_v3  ;;  %v70_v8 = vsub.s32 1, %v65_v3  ;;  %vm57_vm0 = vcmp.lt.s32.totalorder %v49_v4, 112  ;;  %vm50_vm1 = vcmp.lt.s32.totalorder %v49_v4, 127  ;;  %p173_p10 = scmp.ne.s32.totalorder %s103_s28, %s172_s30  ;;  %p178_p12 = scmp.lt.s32.totalorder %s172_s30, %s172_s30 }
  0x1f   :  { %55 = vrot.lane.b32.xlu1 %v43_v1, %s222_s25  ;;  %46 = vrot.lane.b32.xlu0 %v43_v1, %s223_s26 }
  0x20   :  { %v85_v11 = vrot.slane %v80_v9, %v66_v7  ;;  %v89_v12 = vrot.slane %v80_v9, %v70_v8  ;;  %v67_v14 = vrot.slane %v62_v10, %v66_v7  ;;  %v71_v15 = vrot.slane %v62_v10, %v70_v8  ;;  %p179_p13 = por %p178_p12, %p177_p11 }
  0x22   :  { %p180_p0 = pnand %p179_p13, %p173_p10 }
  0x8d   :  { %v54_v5 = vpop.permute.xlu1 %53  ;;  %v45_v6 = vpop.permute.xlu0 %44 }
  0x91   :  { %v56_v13 = vpop.permute.xlu1 %55  ;;  %v47_v16 = vpop.permute.xlu0 %46 }
  0x92   :  { %v58_v17 = vsel %vm57_vm0, %v54_v5, %v56_v13  ;;  %v59_v18 = vsel %vm57_vm0, %v56_v13, %v54_v5  ;;  %v51_v19 = vsel %vm50_vm1, %v45_v6, %v47_v16  ;;  %v52_v20 = vsel %vm50_vm1, %v47_v16, %v45_v6 }
  0x93   :  { %v78_v21 = vsub.f32 %v58_v17, %v42_v0  ;;  %v79_v22 = vsub.f32 %v59_v18, %v43_v1  ;;  %v60_v23 = vsub.f32 %v51_v19, %v42_v0  ;;  %v61_v24 = vsub.f32 %v52_v20, %v43_v1 }
  0x95   :  { %v92_v25 = vmul.f32 %v85_v11, %v78_v21  ;;  %v93_v26 = vmul.f32 %v89_v12, %v79_v22  ;;  %v74_v27 = vmul.f32 %v67_v14, %v60_v23  ;;  %v75_v28 = vmul.f32 %v71_v15, %v61_v24 }
  0x97   :  { %94 = vst [vmem:[#allocation8] sm:$0xff] %v92_v25  ;;  %95 = vst [vmem:[#allocation8 + $0x8] sm:$0xff] %v93_v26 }
  0x98   :  { %76 = vst [vmem:[#allocation7] sm:$0xff] %v74_v27  ;;  %77 = vst [vmem:[#allocation7 + $0x8] sm:$0xff] %v75_v28 }
  0x99   :  { %183 = shalt.err (!%p180_p0)
}
  0x9a   :  { %105 = dma.vmem_to_hbm [thread:$0]  %s103_s28, 256, %s269_s3, [#allocation4]  }
  0x9b   :  { %s192_s7 = scalar_lea.vmem %s113_s29, 256  ;;  %p197_p2 = scmp.lt.s32.totalorder %s113_s29, %s113_s29 }
  0x9c   :  { %p193_p1 = scmp.ne.s32.totalorder %s113_s29, %s192_s7  ;;  %p198_p3 = scmp.lt.s32.totalorder %s192_s7, %s192_s7 }
  0x9e   :  { %p199_p4 = por %p198_p3, %p197_p2 }
  0xa0   :  { %p200_p5 = pnand %p199_p4, %p193_p1 }
  0xa2   :  { %203 = shalt.err (!%p200_p5)
}
  0xa3   :  { %115 = dma.vmem_to_hbm [thread:$0]  %s113_s29, 256, %s270_s4, [#allocation9]  }
  0xa4   :  { %216 = dma.done.wait [#allocation4], 256  }
  0xa5   :  { %217 = vsyncadd [#allocation4], 4294967040 }
  0xa6   :  { %218 = dma.done.wait [#allocation9], 256  }
  0xa7   :  { %219 = vsyncadd [#allocation9], 4294967040 }
  0xa8   :  { %122 = vsyncpa [#allocation3], 1 }
  0xa9   :  { %123 = vsyncpa [#allocation6], 1 }
  0xaa   :  { %124 = vsyncpa [#allocation4], 1 }
  0xab   :  { %125 = vsyncpa [#allocation9], 1 }

</bundles_post_ra>
